<compile_context>
chip_gen: v7x
topology: tpu7x:2x2x1
jax: 0.10.0
libtpu: 0.0.40
codegen_flags: <defaults>
</compile_context>

<pallas_src>
import math

import jax
import jax.numpy as jnp
from jax.experimental import pallas as pl
from jax.experimental.pallas import tpu as pltpu


def _linear_weight_matrix(in_size, out_size, align_corners, scale=None):
    """(out_size, in_size) 1-D linear-interpolation matrix matching
    torch.nn.functional.interpolate's coordinate convention.

    `scale` is the src-units-per-dst-unit step; when the module is given a
    scale_factor, PyTorch (recompute_scale_factor=False default) uses
    1/scale_factor directly, which is what the caller passes here.
    """
    dst = jnp.arange(out_size, dtype=jnp.float32)
    if align_corners:
        if out_size > 1:
            src = dst * ((in_size - 1) / (out_size - 1))
        else:
            src = jnp.zeros_like(dst)
    else:
        s = (in_size / out_size) if scale is None else float(scale)
        # PyTorch clamps negative half-pixel source coordinates to 0.
        src = jnp.maximum((dst + 0.5) * s - 0.5, 0.0)
    x0 = jnp.clip(jnp.floor(src), 0, in_size - 1).astype(jnp.int32)
    x1 = jnp.minimum(x0 + 1, in_size - 1)
    lam = src - x0.astype(jnp.float32)
    w = jnp.zeros((out_size, in_size), jnp.float32)
    rows = jnp.arange(out_size)
    w = w.at[rows, x0].add(1.0 - lam)
    w = w.at[rows, x1].add(lam)
    return w


def _interp_kernel(x_ref, wh_ref, wwt_ref, o_ref):
    # x_ref  : (bB, H_in,  W_in)   block of N*C images
    # wh_ref : (H_out, H_in)       height interpolation weights (resident)
    # wwt_ref: (W_in,  W_out)      width interpolation weights^T (resident)
    # o_ref  : (bB, H_out, W_out)
    x = x_ref[...]
    bB = x.shape[0]

    # Width pass: per-image (H_in, W_in) @ (W_in, W_out), batched on the MXU.
    wwt_b = jnp.broadcast_to(wwt_ref[...][None], (bB,) + wwt_ref.shape)
    t = jax.lax.dot_general(
        x, wwt_b,
        dimension_numbers=(((2,), (1,)), ((0,), (0,))),
        preferred_element_type=jnp.float32)          # (bB, H_in, W_out)

    # Height pass: per-image (H_out, H_in) @ (H_in, W_out), batched on the MXU.
    wh_b = jnp.broadcast_to(wh_ref[...][None], (bB,) + wh_ref.shape)
    o = jax.lax.dot_general(
        wh_b, t,
        dimension_numbers=(((2,), (1,)), ((0,), (0,))),
        preferred_element_type=jnp.float32)          # (bB, H_out, W_out)

    o_ref[...] = o.astype(o_ref.dtype)


def interpolate_bilinear(x, size=None, scale_factor=None, align_corners=False):
    """Equivalent of Interpolate(size, scale_factor, mode='bilinear',
    align_corners).forward(x) for NCHW float input."""
    N, C, H, W = x.shape

    if size is not None:
        if isinstance(size, (tuple, list)):
            H_out, W_out = int(size[0]), int(size[1])
        else:
            H_out = W_out = int(size)
        sh = sw = None
    else:
        if isinstance(scale_factor, (tuple, list)):
            sfh, sfw = scale_factor
        else:
            sfh = sfw = scale_factor
        # PyTorch: output_size = floor(input_size * scale_factor)
        H_out = int(math.floor(H * sfh))
        W_out = int(math.floor(W * sfw))
        sh, sw = 1.0 / sfh, 1.0 / sfw

    wh = _linear_weight_matrix(H, H_out, align_corners, sh)       # (H_out, H)
    wwt = _linear_weight_matrix(W, W_out, align_corners, sw).T    # (W, W_out)

    B = N * C
    # Free view — no HBM transpose, pure reshape of contiguous NCHW data.
    x3 = x.reshape(B, H, W)

    # Batch-block size: keep the per-step (in + out) footprint small enough
    # that double-buffering fits comfortably on every TPU generation.
    itemsize = jnp.dtype(x.dtype).itemsize
    bytes_per_img = (H * W + H_out * W_out) * itemsize
    budget = 8 * 1024 * 1024            # per-step, before double buffering
    bB = max(1, min(B, budget // max(bytes_per_img, 1)))
    while B % bB:                        # largest divisor of B that fits
        bB -= 1
    n_steps = B // bB

    flops = 2 * B * (H * W * W_out + H_out * H * W_out)
    bytes_accessed = (B * H * W + B * H_out * W_out) * itemsize \
        + (wh.size + wwt.size) * 4

    out3 = pl.pallas_call(
        _interp_kernel,
        out_shape=jax.ShapeDtypeStruct((B, H_out, W_out), x.dtype),
        grid_spec=pltpu.PrefetchScalarGridSpec(
            num_scalar_prefetch=0,
            grid=(n_steps,),
            in_specs=[
                pl.BlockSpec((bB, H, W), lambda i: (i, 0, 0)),
                pl.BlockSpec((H_out, H), lambda i: (0, 0)),       # resident
                pl.BlockSpec((W, W_out), lambda i: (0, 0)),       # resident
            ],
            out_specs=pl.BlockSpec((bB, H_out, W_out), lambda i: (i, 0, 0)),
        ),
        compiler_params=pltpu.CompilerParams(
            dimension_semantics=("parallel",)),
        cost_estimate=pl.CostEstimate(
            flops=flops, transcendentals=0, bytes_accessed=bytes_accessed),
    )(x3, wh, wwt)

    # Free view back to NCHW — again no transpose.
    return out3.reshape(N, C, H_out, W_out)


if __name__ == "__main__":
    key = jax.random.PRNGKey(0)
    # Module config for this instance:
    #   Interpolate(scale_factor=2, mode='bilinear', align_corners=False)
    x = jax.random.normal(key, (2, 4, 16, 16), dtype=jnp.float32)

    fn = jax.jit(lambda v: interpolate_bilinear(
        v, scale_factor=2, align_corners=False))
    y = jax.block_until_ready(fn(x))

    # Pure-JAX reference using the same separable-weight formulation.
    wh_ref = _linear_weight_matrix(16, 32, False, 0.5)
    wwt_ref = _linear_weight_matrix(16, 32, False, 0.5).T
    ref = jnp.einsum("ph,nchw,wq->ncpq", wh_ref, x, wwt_ref)

    assert y.shape == (2, 4, 32, 32)
    assert jnp.allclose(y, ref, atol=1e-5, rtol=1e-5), "mismatch vs reference"

    print("KERNEL_OK")
</pallas_src>

<mosaic_0001>
module attributes {stable_mosaic.version = 11 : i64} {
  func.func private @main(%arg0: i32) attributes {dimension_semantics = [#tpu.dimension_semantics<core_parallel>], iteration_bounds = array<i64: 2>, tpu.core_type = #tpu.core_type<sc_scalar_subcore>, window_params = []} {
    return
  }
}

module attributes {stable_mosaic.version = 11 : i64} {
  func.func private @main(%arg0: i32) attributes {dimension_semantics = [#tpu.dimension_semantics<core_parallel>], iteration_bounds = array<i64: 2>, tpu.core_type = #tpu.core_type<sc_scalar_subcore>, window_params = []} {
    return
  }
}

module attributes {stable_mosaic.version = 11 : i64} {
  func.func @_interp_kernel(%arg0: i32, %arg1: memref<8x16x16xf32, #tpu.memory_space<vmem>>, %arg2: memref<32x16xf32, #tpu.memory_space<vmem>>, %arg3: memref<16x32xf32, #tpu.memory_space<vmem>>, %arg4: memref<8x32x32xf32, #tpu.memory_space<vmem>>) attributes {dimension_semantics = [#tpu.dimension_semantics<parallel>], iteration_bounds = array<i64: 1>, scalar_prefetch = 0 : i64, scratch_operands = 0 : i64, tpu.core_type = #tpu.core_type<tc>, window_params = [{transform_indices = @transform_0, window_bounds = array<i64: 8, 16, 16>}, {pipeline_mode = #tpu.pipeline_mode<synchronous>, transform_indices = @transform_1, window_bounds = array<i64: 32, 16>}, {pipeline_mode = #tpu.pipeline_mode<synchronous>, transform_indices = @transform_2, window_bounds = array<i64: 16, 32>}, {transform_indices = @transform_3, window_bounds = array<i64: 8, 32, 32>}]} {
    %c0 = arith.constant 0 : index
    %c0_0 = arith.constant 0 : index
    %c0_1 = arith.constant 0 : index
    %0 = vector.load %arg1[%c0, %c0_0, %c0_1] : memref<8x16x16xf32, #tpu.memory_space<vmem>>, vector<8x16x16xf32>
    %c0_2 = arith.constant 0 : index
    %c0_3 = arith.constant 0 : index
    %1 = vector.load %arg3[%c0_2, %c0_3] : memref<16x32xf32, #tpu.memory_space<vmem>>, vector<16x32xf32>
    %2 = vector.shape_cast %1 : vector<16x32xf32> to vector<1x16x32xf32>
    %3 = vector.shape_cast %2 : vector<1x16x32xf32> to vector<1x16x32xf32>
    %4 = vector.broadcast %3 : vector<1x16x32xf32> to vector<8x16x32xf32>
    %cst = arith.constant dense<0.000000e+00> : vector<8x16x32xf32>
    %5 = tpu.matmul %0, %4, %cst {dimension_numbers = #tpu.dot_dimension_numbers<[2], [1], [1], [2], [0, 0, 0, 1, 1, 2], [0], [0]>} : vector<8x16x16xf32>, vector<8x16x32xf32>, vector<8x16x32xf32> -> vector<8x16x32xf32>
    %c0_4 = arith.constant 0 : index
    %c0_5 = arith.constant 0 : index
    %6 = vector.load %arg2[%c0_4, %c0_5] : memref<32x16xf32, #tpu.memory_space<vmem>>, vector<32x16xf32>
    %7 = vector.shape_cast %6 : vector<32x16xf32> to vector<1x32x16xf32>
    %8 = vector.shape_cast %7 : vector<1x32x16xf32> to vector<1x32x16xf32>
    %9 = vector.broadcast %8 : vector<1x32x16xf32> to vector<8x32x16xf32>
    %cst_6 = arith.constant dense<0.000000e+00> : vector<8x32x32xf32>
    %10 = tpu.matmul %9, %5, %cst_6 {dimension_numbers = #tpu.dot_dimension_numbers<[2], [1], [1], [2], [0, 0, 0, 1, 1, 2], [0], [0]>} : vector<8x32x16xf32>, vector<8x16x32xf32>, vector<8x32x32xf32> -> vector<8x32x32xf32>
    %c0_7 = arith.constant 0 : index
    %c0_8 = arith.constant 0 : index
    %c0_9 = arith.constant 0 : index
    %11 = vector.load %arg4[%c0_7, %c0_8, %c0_9] : memref<8x32x32xf32, #tpu.memory_space<vmem>>, vector<8x32x32xf32>
    tpu.vector_store %arg4[%c0_7, %c0_8, %c0_9], %10 {strides = array<i32>} : memref<8x32x32xf32, #tpu.memory_space<vmem>>, vector<8x32x32xf32>,
    return
  }
  func.func @transform_0(%arg0: i32) -> (i32, i32, i32) {
    %c0_i32 = arith.constant 0 : i32
    %c0_i32_0 = arith.constant 0 : i32
    %c0_i32_1 = arith.constant 0 : i32
    return %arg0, %c0_i32, %c0_i32_0 : i32, i32, i32
  }
  func.func @transform_1(%arg0: i32) -> (i32, i32) {
    %c0_i32 = arith.constant 0 : i32
    %c0_i32_0 = arith.constant 0 : i32
    %c0_i32_1 = arith.constant 0 : i32
    return %c0_i32, %c0_i32_0 : i32, i32
  }
  func.func @transform_2(%arg0: i32) -> (i32, i32) {
    %c0_i32 = arith.constant 0 : i32
    %c0_i32_0 = arith.constant 0 : i32
    %c0_i32_1 = arith.constant 0 : i32
    return %c0_i32, %c0_i32_0 : i32, i32
  }
  func.func @transform_3(%arg0: i32) -> (i32, i32, i32) {
    %c0_i32 = arith.constant 0 : i32
    %c0_i32_0 = arith.constant 0 : i32
    %c0_i32_1 = arith.constant 0 : i32
    return %arg0, %c0_i32, %c0_i32_0 : i32, i32, i32
  }
}

</mosaic_0001>

<bundles_post_ra>
// kernel: _lambda_.1
= control target key start
LH: loop header
LB: loop body
LE: loop exit
PB: predicated region body
PF: predicated region fallthrough
CT: control target
= control target key end

     0   :  { %vm33_vm0 = vcmask 130048   ;;  %s1973_s0 = inlined_call_operand.vmem [shape: f32[8,16,16], index: 0, kind: input, shape index: {}]   ;;  %s1974_s1 = inlined_call_operand.vmem [shape: f32[32,16], index: 1, kind: input, shape index: {}]   ;;  %s1975_s2 = inlined_call_operand.vmem [shape: f32[16,32], index: 2, kind: input, shape index: {}]   ;;  %s1976_s3 = inlined_call_operand.hbm [shape: f32[8,32,32], index: 3, kind: output, shape index: {}]  }
   0x1   :  { %v31_v0 = vld [vmem:[%s1975_s2] sm:$0xff]  ;;  %v32_v1 = vld [vmem:[%s1975_s2 + $0x8] sm:$0xff]  ;;  %v17_v4 = vld [vmem:[%s1973_s0 + $0x10] sm:$0xff] }
   0x2   :  { %v15_v2 = vld [vmem:[%s1973_s0] sm:$0xff]  ;;  %v1691_v3 = vpack.c.bf16 %v32_v1, %v31_v0  ;;  %1566 = vmatprep.mubr.msk.f32.mxu1 %vm33_vm0, %v17_v4  ;;  %v16_v5 = vld [vmem:[%s1973_s0 + $0x8] sm:$0xff]  ;;  %v18_v6 = vld [vmem:[%s1973_s0 + $0x18] sm:$0xff] }
   0x3   :  { %1559 = vmatprep.mubr.msk.f32.mxu0 %vm33_vm0, %v15_v2  ;;  %v19_v7 = vld [vmem:[%s1973_s0 + $0x20] sm:$0xff]  ;;  %v21_v8 = vld [vmem:[%s1973_s0 + $0x30] sm:$0xff] }
   0x4   :  { %1692 = vmatprep.subr.bf16.mxu0 %v1691_v3  ;;  %1696 = vmatprep.subr.bf16.mxu1 %v1691_v3 }
   0x5   :  { %1694 = vmatpush3.bf16.msra.mxu0 %v1691_v3  ;;  %1698 = vmatpush3.bf16.msra.mxu1 %v1691_v3 }
   0x6   :  { %1700 = vmatprep.subr.bf16.mxu0 %v1691_v3  ;;  %1704 = vmatprep.subr.bf16.mxu1 %v1691_v3 }
   0x7   :  { %8 = vsyncpa [#allocation3], 0  ;;  %v20_v9 = vld [vmem:[%s1973_s0 + $0x28] sm:$0xff]  ;;  %v22_v10 = vld [vmem:[%s1973_s0 + $0x38] sm:$0xff]  ;;  %vm1378_vm1 = vcmask 261120  }
   0x8   :  { %1560 = vmatmul.mubr.msk.f32.vlgmr.msra.gmra.mrb[0].mxu0 %vm33_vm0, %v16_v5  ;;  %1567 = vmatmul.mubr.msk.f32.vlgmr.msra.gmra.mrb[0].mxu1 %vm33_vm0, %v18_v6  ;;  %v23_v11 = vld [vmem:[%s1973_s0 + $0x40] sm:$0xff]  ;;  %v25_v12 = vld [vmem:[%s1973_s0 + $0x50] sm:$0xff]  ;;  %v24_v13 = vld [vmem:[%s1973_s0 + $0x48] sm:$0xff] }
   0x9   :  { %1702 = vmatpush3.bf16.msra.mxu0 %v1691_v3  ;;  %1706 = vmatpush3.bf16.msra.mxu1 %v1691_v3  ;;  %v26_v14 = vld [vmem:[%s1973_s0 + $0x58] sm:$0xff]  ;;  %v27_v15 = vld [vmem:[%s1973_s0 + $0x60] sm:$0xff]  ;;  %v29_v16 = vld [vmem:[%s1973_s0 + $0x70] sm:$0xff] }
   0xa   :  { %1573 = vmatprep.mubr.msk.f32.mxu0 %vm33_vm0, %v19_v7  ;;  %1580 = vmatprep.mubr.msk.f32.mxu1 %vm33_vm0, %v21_v8  ;;  %v28_v17 = vld [vmem:[%s1973_s0 + $0x68] sm:$0xff]  ;;  %v30_v18 = vld [vmem:[%s1973_s0 + $0x78] sm:$0xff]  ;;  %v1878_v19 = vld [vmem:[%s1974_s1] sm:$0xff] }
   0xb   :  { %1708 = vmatprep.subr.bf16.mxu0 %v1691_v3  ;;  %1712 = vmatprep.subr.bf16.mxu1 %v1691_v3  ;;  %v683_v30 = vld [vmem:[%s1974_s1 + $0x8] sm:$0xff]  ;;  %v684_v35 = vld [vmem:[%s1974_s1 + $0x10] sm:$0xff]  ;;  %v685_v38 = vld [vmem:[%s1974_s1 + $0x18] sm:$0xff]  ;;  %s1782_s1 = smov [#allocation2]  }
   0xc   :  { %1574 = vmatmul.mubr.msk.f32.vlgmr.msra.gmra.mrb[2].mxu0 %vm33_vm0, %v20_v9  ;;  %1581 = vmatmul.mubr.msk.f32.vlgmr.msra.gmra.mrb[2].mxu1 %vm33_vm0, %v22_v10  ;;  %s1416_s26 = sshll.u32 %s1782_s1, 4  ;;  %s1417_s26 = int_to_ptr.vmem [resolvable:$true] %s1416_s26 }
   0xd   :  { %1710 = vmatpush3.bf16.msra.mxu0 %v1691_v3  ;;  %1714 = vmatpush3.bf16.msra.mxu1 %v1691_v3  ;;  %s1758_s27 = scalar_lea.vmem %s1417_s26, 4096  ;;  %p1763_p1 = scmp.lt.s32.totalorder %s1417_s26, %s1417_s26 }
   0xe   :  { %1587 = vmatprep.mubr.msk.f32.mxu0 %vm33_vm0, %v23_v11  ;;  %1594 = vmatprep.mubr.msk.f32.mxu1 %vm33_vm0, %v25_v12  ;;  %p1759_p0 = scmp.ne.s32.totalorder %s1417_s26, %s1758_s27  ;;  %p1764_p2 = scmp.lt.s32.totalorder %s1758_s27, %s1758_s27 }
   0xf   :  { %1716 = vmatprep.subr.bf16.mxu0 %v1691_v3  ;;  %1720 = vmatprep.subr.bf16.mxu1 %v1691_v3 }
  0x10   :  { %1588 = vmatmul.mubr.msk.f32.vlgmr.msra.gmra.mrb[4].mxu0 %vm33_vm0, %v24_v13  ;;  %1595 = vmatmul.mubr.msk.f32.vlgmr.msra.gmra.mrb[4].mxu1 %vm33_vm0, %v26_v14  ;;  %p1765_p3 = por %p1764_p2, %p1763_p1 }
  0x11   :  { %1718 = vmatpush3.bf16.msra.mxu0 %v1691_v3  ;;  %1722 = vmatpush3.bf16.msra.mxu1 %v1691_v3 }
  0x12   :  { %1601 = vmatprep.mubr.msk.f32.mxu0 %vm33_vm0, %v27_v15  ;;  %1608 = vmatprep.mubr.msk.f32.mxu1 %vm33_vm0, %v29_v16  ;;  %p1766_p4 = pnand %p1765_p3, %p1759_p0 }
  0x14   :  { %1602 = vmatmul.mubr.msk.f32.vlgmr.msra.gmra.mrb[6].mxu0 %vm33_vm0, %v28_v17  ;;  %1609 = vmatmul.mubr.msk.f32.vlgmr.msra.gmra.mrb[6].mxu1 %vm33_vm0, %v30_v18 }
  0x15   :  { %1615 = vmatprep.mubr.msk.f32.mxu0 %vm33_vm0, %v1878_v19  ;;  %1625 = vmatprep.mubr.msk.f32.mxu1 %vm33_vm0, %v1878_v19 }
  0xdb   :  { %v1561_v20 = vpop.f32.mrb[0].mxu0  ;;  %v1568_v21 = vpop.f32.mrb[0].mxu1 }
  0xdc   :  { %v106_v22 = vpop.f32.mrb[1].mxu0  ;;  %v187_v23 = vpop.f32.mrb[1].mxu1 }
  0xdd   :  { %v1723_v24 = vpack.c.bf16 %v1561_v20, %v106_v22  ;;  %v1727_v25 = vpack.c.bf16 %v1568_v21, %v187_v23 }
  0xdf   :  { %v1575_v26 = vpop.f32.mrb[2].mxu0  ;;  %v1582_v27 = vpop.f32.mrb[2].mxu1  ;;  %1724 = vmatprep.subr.bf16.mxu0 %v1723_v24  ;;  %1728 = vmatprep.subr.bf16.mxu1 %v1727_v25 }
  0xe0   :  { %v268_v28 = vpop.f32.mrb[3].mxu0  ;;  %v349_v29 = vpop.f32.mrb[3].mxu1  ;;  %1726 = vmatpush3.bf16.msra.mxu0 %v1723_v24  ;;  %1730 = vmatpush3.bf16.msra.mxu1 %v1727_v25 }
  0xe1   :  { %v1731_v31 = vpack.c.bf16 %v1575_v26, %v268_v28  ;;  %v1735_v32 = vpack.c.bf16 %v1582_v27, %v349_v29 }
  0xe3   :  { %1616 = vmatmul.mubr.msk.f32.vlgmr.msra.gmra.mrb[8].mxu0 %vm33_vm0, %v683_v30  ;;  %1626 = vmatmul.mubr.msk.f32.vlgmr.msra.gmra.mrb[8].mxu1 %vm33_vm0, %v683_v30  ;;  %v1589_v33 = vpop.f32.mrb[4].mxu0  ;;  %v1596_v34 = vpop.f32.mrb[4].mxu1 }
  0xe4   :  { %1732 = vmatprep.subr.bf16.mxu0 %v1731_v31  ;;  %1736 = vmatprep.subr.bf16.mxu1 %v1735_v32  ;;  %v430_v36 = vpop.f32.mrb[5].mxu0  ;;  %v511_v37 = vpop.f32.mrb[5].mxu1 }
  0xe5   :  { %1734 = vmatpush3.bf16.msra.mxu0 %v1731_v31  ;;  %1738 = vmatpush3.bf16.msra.mxu1 %v1735_v32  ;;  %v1739_v39 = vpack.c.bf16 %v1589_v33, %v430_v36  ;;  %v1743_v40 = vpack.c.bf16 %v1596_v34, %v511_v37 }
  0xe6   :  { %1618 = vmatprep.mubr.msk.f32.mxu0 %vm33_vm0, %v684_v35  ;;  %1628 = vmatprep.mubr.msk.f32.mxu1 %vm33_vm0, %v684_v35 }
  0xe7   :  { %1619 = vmatmul.mubr.msk.f32.gmra.mrb[10].mxu0 %vm33_vm0, %v685_v38  ;;  %1629 = vmatmul.mubr.msk.f32.gmra.mrb[10].mxu1 %vm33_vm0, %v685_v38  ;;  %v1603_v41 = vpop.f32.mrb[6].mxu0  ;;  %v1610_v42 = vpop.f32.mrb[6].mxu1 }
  0xe8   :  { %1635 = vmatprep.mubr.msk.f32.mxu0 %vm33_vm0, %v1878_v19  ;;  %1645 = vmatprep.mubr.msk.f32.mxu1 %vm33_vm0, %v1878_v19  ;;  %v592_v43 = vpop.f32.mrb[7].mxu0  ;;  %v673_v44 = vpop.f32.mrb[7].mxu1 }
  0xe9   :  { %1740 = vmatprep.subr.bf16.mxu0 %v1739_v39  ;;  %1744 = vmatprep.subr.bf16.mxu1 %v1743_v40  ;;  %v1747_v45 = vpack.c.bf16 %v1603_v41, %v592_v43  ;;  %v1751_v46 = vpack.c.bf16 %v1610_v42, %v673_v44 }
  0xeb   :  { %1636 = vmatmul.mubr.msk.f32.vlgmr.msra.gmra.mrb[12].mxu0 %vm33_vm0, %v683_v30  ;;  %1646 = vmatmul.mubr.msk.f32.vlgmr.msra.gmra.mrb[12].mxu1 %vm33_vm0, %v683_v30 }
  0xec   :  { %1742 = vmatpush3.bf16.msra.mxu0 %v1739_v39  ;;  %1746 = vmatpush3.bf16.msra.mxu1 %v1743_v40 }
  0xed   :  { %1638 = vmatprep.mubr.msk.f32.mxu0 %vm33_vm0, %v684_v35  ;;  %1648 = vmatprep.mubr.msk.f32.mxu1 %vm33_vm0, %v684_v35 }
  0xee   :  { %1748 = vmatprep.subr.bf16.mxu0 %v1747_v45  ;;  %1752 = vmatprep.subr.bf16.mxu1 %v1751_v46 }
  0xef   :  { %1639 = vmatmul.mubr.msk.f32.gmra.mrb[14].mxu0 %vm33_vm0, %v685_v38  ;;  %1649 = vmatmul.mubr.msk.f32.gmra.mrb[14].mxu1 %vm33_vm0, %v685_v38 }
  0xf0   :  { %1655 = vmatprep.mubr.msk.f32.mxu0 %vm33_vm0, %v1878_v19  ;;  %1665 = vmatprep.mubr.msk.f32.mxu1 %vm33_vm0, %v1878_v19 }
  0xf3   :  { %1656 = vmatmul.mubr.msk.f32.vlgmr.msra.gmra.mrb[16].mxu0 %vm33_vm0, %v683_v30  ;;  %1666 = vmatmul.mubr.msk.f32.vlgmr.msra.gmra.mrb[16].mxu1 %vm33_vm0, %v683_v30 }
  0xf4   :  { %1750 = vmatpush3.bf16.msra.mxu0 %v1747_v45  ;;  %1754 = vmatpush3.bf16.msra.mxu1 %v1751_v46 }
  0xf5   :  { %1658 = vmatprep.mubr.msk.f32.mxu0 %vm33_vm0, %v684_v35  ;;  %1668 = vmatprep.mubr.msk.f32.mxu1 %vm33_vm0, %v684_v35 }
  0xf7   :  { %1659 = vmatmul.mubr.msk.f32.gmra.mrb[18].mxu0 %vm33_vm0, %v685_v38  ;;  %1669 = vmatmul.mubr.msk.f32.gmra.mrb[18].mxu1 %vm33_vm0, %v685_v38 }
  0xf8   :  { %1675 = vmatprep.mubr.msk.f32.mxu0 %vm33_vm0, %v1878_v19  ;;  %1685 = vmatprep.mubr.msk.f32.mxu1 %vm33_vm0, %v1878_v19 }
  0xfb   :  { %1676 = vmatmul.mubr.msk.f32.vlgmr.msra.gmra.mrb[20].mxu0 %vm33_vm0, %v683_v30  ;;  %1686 = vmatmul.mubr.msk.f32.vlgmr.msra.gmra.mrb[20].mxu1 %vm33_vm0, %v683_v30 }
  0xfc   :  { %1678 = vmatprep.mubr.msk.f32.mxu0 %vm33_vm0, %v684_v35  ;;  %1688 = vmatprep.mubr.msk.f32.mxu1 %vm33_vm0, %v684_v35 }
  0xff   :  { %1679 = vmatmul.mubr.msk.f32.gmra.mrb[22].mxu0 %vm33_vm0, %v685_v38  ;;  %1689 = vmatmul.mubr.msk.f32.gmra.mrb[22].mxu1 %vm33_vm0, %v685_v38 }
 0x1b6   :  { %v1617_v47 = vpop.f32.mrb[8].mxu0  ;;  %v1627_v48 = vpop.f32.mrb[8].mxu1 }
 0x1b7   :  { %1380 = vst.msk [vmem:[#allocation2 + $0x8] sm:$0xff] %vm1378_vm1, %v1617_v47  ;;  %1384 = vst.msk [vmem:[#allocation2 + $0x28] sm:$0xff] %vm1378_vm1, %v1627_v48  ;;  %v764_v49 = vpop.f32.mrb[9].mxu0  ;;  %v849_v50 = vpop.f32.mrb[9].mxu1 }
 0x1b8   :  { %1379 = vst.msk [vmem:[#allocation2] sm:$0xff] %vm1378_vm1, %v764_v49  ;;  %1383 = vst.msk [vmem:[#allocation2 + $0x20] sm:$0xff] %vm1378_vm1, %v849_v50 }
 0x1ba   :  { %v1620_v51 = vpop.f32.mrb[10].mxu0  ;;  %v1630_v52 = vpop.f32.mrb[10].mxu1 }
 0x1bb   :  { %1382 = vst.msk [vmem:[#allocation2 + $0x18] sm:$0xff] %vm1378_vm1, %v1620_v51  ;;  %1386 = vst.msk [vmem:[#allocation2 + $0x38] sm:$0xff] %vm1378_vm1, %v1630_v52  ;;  %v774_v53 = vpop.f32.mrb[11].mxu0  ;;  %v859_v54 = vpop.f32.mrb[11].mxu1 }
 0x1bc   :  { %1381 = vst.msk [vmem:[#allocation2 + $0x10] sm:$0xff] %vm1378_vm1, %v774_v53  ;;  %1385 = vst.msk [vmem:[#allocation2 + $0x30] sm:$0xff] %vm1378_vm1, %v859_v54 }
 0x1be   :  { %v1637_v55 = vpop.f32.mrb[12].mxu0  ;;  %v1647_v56 = vpop.f32.mrb[12].mxu1 }
 0x1bf   :  { %1388 = vst.msk [vmem:[#allocation2 + $0x48] sm:$0xff] %vm1378_vm1, %v1637_v55  ;;  %1392 = vst.msk [vmem:[#allocation2 + $0x68] sm:$0xff] %vm1378_vm1, %v1647_v56  ;;  %v934_v57 = vpop.f32.mrb[13].mxu0  ;;  %v1019_v58 = vpop.f32.mrb[13].mxu1 }
 0x1c0   :  { %1387 = vst.msk [vmem:[#allocation2 + $0x40] sm:$0xff] %vm1378_vm1, %v934_v57  ;;  %1391 = vst.msk [vmem:[#allocation2 + $0x60] sm:$0xff] %vm1378_vm1, %v1019_v58 }
 0x1c2   :  { %v1640_v59 = vpop.f32.mrb[14].mxu0  ;;  %v1650_v60 = vpop.f32.mrb[14].mxu1 }
 0x1c3   :  { %1390 = vst.msk [vmem:[#allocation2 + $0x58] sm:$0xff] %vm1378_vm1, %v1640_v59  ;;  %1394 = vst.msk [vmem:[#allocation2 + $0x78] sm:$0xff] %vm1378_vm1, %v1650_v60  ;;  %v944_v61 = vpop.f32.mrb[15].mxu0  ;;  %v1029_v62 = vpop.f32.mrb[15].mxu1 }
 0x1c4   :  { %1389 = vst.msk [vmem:[#allocation2 + $0x50] sm:$0xff] %vm1378_vm1, %v944_v61  ;;  %1393 = vst.msk [vmem:[#allocation2 + $0x70] sm:$0xff] %vm1378_vm1, %v1029_v62 }
 0x1c6   :  { %v1657_v63 = vpop.f32.mrb[16].mxu0  ;;  %v1667_v0 = vpop.f32.mrb[16].mxu1 }
 0x1c7   :  { %1396 = vst.msk [vmem:[#allocation2 + $0x88] sm:$0xff] %vm1378_vm1, %v1657_v63  ;;  %1400 = vst.msk [vmem:[#allocation2 + $0xa8] sm:$0xff] %vm1378_vm1, %v1667_v0  ;;  %v1104_v1 = vpop.f32.mrb[17].mxu0  ;;  %v1189_v2 = vpop.f32.mrb[17].mxu1 }
 0x1c8   :  { %1395 = vst.msk [vmem:[#allocation2 + $0x80] sm:$0xff] %vm1378_vm1, %v1104_v1  ;;  %1399 = vst.msk [vmem:[#allocation2 + $0xa0] sm:$0xff] %vm1378_vm1, %v1189_v2 }
 0x1ca   :  { %v1660_v3 = vpop.f32.mrb[18].mxu0  ;;  %v1670_v4 = vpop.f32.mrb[18].mxu1 }
 0x1cb   :  { %1398 = vst.msk [vmem:[#allocation2 + $0x98] sm:$0xff] %vm1378_vm1, %v1660_v3  ;;  %1402 = vst.msk [vmem:[#allocation2 + $0xb8] sm:$0xff] %vm1378_vm1, %v1670_v4  ;;  %v1114_v5 = vpop.f32.mrb[19].mxu0  ;;  %v1199_v6 = vpop.f32.mrb[19].mxu1 }
 0x1cc   :  { %1397 = vst.msk [vmem:[#allocation2 + $0x90] sm:$0xff] %vm1378_vm1, %v1114_v5  ;;  %1401 = vst.msk [vmem:[#allocation2 + $0xb0] sm:$0xff] %vm1378_vm1, %v1199_v6 }
 0x1ce   :  { %v1677_v7 = vpop.f32.mrb[20].mxu0  ;;  %v1687_v8 = vpop.f32.mrb[20].mxu1 }
 0x1cf   :  { %1404 = vst.msk [vmem:[#allocation2 + $0xc8] sm:$0xff] %vm1378_vm1, %v1677_v7  ;;  %1408 = vst.msk [vmem:[#allocation2 + $0xe8] sm:$0xff] %vm1378_vm1, %v1687_v8  ;;  %v1274_v9 = vpop.f32.mrb[21].mxu0  ;;  %v1359_v10 = vpop.f32.mrb[21].mxu1 }
 0x1d0   :  { %1403 = vst.msk [vmem:[#allocation2 + $0xc0] sm:$0xff] %vm1378_vm1, %v1274_v9  ;;  %1407 = vst.msk [vmem:[#allocation2 + $0xe0] sm:$0xff] %vm1378_vm1, %v1359_v10 }
 0x1d2   :  { %v1680_v11 = vpop.f32.mrb[22].mxu0  ;;  %v1690_v12 = vpop.f32.mrb[22].mxu1 }
 0x1d3   :  { %1406 = vst.msk [vmem:[#allocation2 + $0xd8] sm:$0xff] %vm1378_vm1, %v1680_v11  ;;  %1410 = vst.msk [vmem:[#allocation2 + $0xf8] sm:$0xff] %vm1378_vm1, %v1690_v12  ;;  %v1284_v13 = vpop.f32.mrb[23].mxu0  ;;  %v1369_v14 = vpop.f32.mrb[23].mxu1 }
 0x1d4   :  { %1405 = vst.msk [vmem:[#allocation2 + $0xd0] sm:$0xff] %vm1378_vm1, %v1284_v13  ;;  %1409 = vst.msk [vmem:[#allocation2 + $0xf0] sm:$0xff] %vm1378_vm1, %v1369_v14 }
 0x1d5   :  { %1769 = shalt.err (!%p1766_p4)
}
 0x1d6   :  { %s1770_s30 = scalar_lea.hbm %s1976_s3, 4096 }
 0x1d7   :  { %p1771_p5 = scmp.ne.s32.totalorder %s1976_s3, %s1770_s30  ;;  %p1774_p6 = scmp.lt.u32.totalorder %s1770_s30, %s1976_s3 }
 0x1d9   :  { %p1776_p7 = pnand %p1774_p6, %p1771_p5 }
 0x1db   :  { %1779 = shalt.err (!%p1776_p7)
}
 0x1dc   :  { %s1783_s8 = smov 128   ;;  %s1784_s9 = smov 8  }
 0x1dd   :  { %1422 = dma.vmem_to_hbm [thread:$0]  %s1417_s26, 4096, %s1976_s3, [#allocation3], %s1783_s8, %s1783_s8, %s1784_s9  }
 0x1de   :  { %1780 = dma.done.wait [#allocation3], 4096  }
 0x1df   :  { %1781 = vsyncadd [#allocation3], 4294963200 }
 0x1e0   :  { %1426 = vsyncpa [#allocation3], 1 }

</bundles_post_ra>
